<compile_context>
chip_gen: v7x
topology: tpu7x:2x2x1
jax: 0.10.0
libtpu: 0.0.40
codegen_flags: <defaults>
</compile_context>

<pallas_src>
import functools

import jax
import jax.numpy as jnp
from jax.experimental import pallas as pl
from jax.experimental.pallas import tpu as pltpu

_LANE = 128
_SUBLANE = 8


def _round_up(n, m):
    return ((n + m - 1) // m) * m


def _ffn_kernel(x_ref, w1_ref, b1_ref, w2_ref, b2_ref, o_ref):
    # fc1: (TM, in) @ (in, hidden) on the MXU, f32 accumulation.
    h = jnp.dot(x_ref[...], w1_ref[...], preferred_element_type=jnp.float32)
    h = jnp.maximum(h + b1_ref[...], 0.0)            # bias + ReLU in f32 (VPU)
    # Match w2's dtype for the second MXU pass: no-op in the f32 path,
    # bf16-native MXU in the bf16 fast path.
    h = h.astype(w2_ref.dtype)
    # fc2: (TM, hidden) @ (hidden, n_pad); n_pad is a multiple of 128, so the store
    # below is an unmasked, lane-dense vst.
    out = jnp.dot(h, w2_ref[...], preferred_element_type=jnp.float32)
    o_ref[...] = (out + b2_ref[...]).astype(o_ref.dtype)


def prepare_params(w1, b1, w2, b2, *, precision="f32"):
    """One-time parameter preparation (hoisted out of the per-call hot path).

    Lane-pads fc2 so the output's last dim is a multiple of 128 and (optionally)
    casts the matmul weights to bf16.  Biases stay f32 so the elementwise work
    stays f32 (v5e has no bf16 VPU).  Returns (params, num_classes)."""
    num_classes = w2.shape[1]
    n_pad = max(_LANE, _round_up(num_classes, _LANE))
    if n_pad != num_classes:
        w2 = jnp.pad(w2, ((0, 0), (0, n_pad - num_classes)))
        b2 = jnp.pad(b2, ((0, 0), (0, n_pad - num_classes)))
    if precision == "bf16":
        w1 = w1.astype(jnp.bfloat16)
        w2 = w2.astype(jnp.bfloat16)
    b1 = b1.astype(jnp.float32)
    b2 = b2.astype(jnp.float32)
    return (w1, b1, w2, b2), num_classes


def _choose_tm(b_pad8, tm_max):
    """Pick a batch tile: single step for small batches, otherwise an even number
    of steps (>=2) so both v7x TensorCores are busy, with TM capped at tm_max."""
    if b_pad8 <= 256:
        return b_pad8
    steps = max(2, pl.cdiv(b_pad8, tm_max))
    if steps % 2:
        steps += 1
    return _round_up(pl.cdiv(b_pad8, steps), _SUBLANE)


@functools.partial(
    jax.jit,
    static_argnames=("num_classes", "tm_max", "precision", "slice_output"),
)
def simple_feed_forward(x, params, *, num_classes, tm_max=2048,
                        precision="f32", slice_output=True):
    """x: (B, input_size); params from prepare_params(). Returns (B, num_classes)
    (or the padded (B_pad, n_pad) result if slice_output=False)."""
    w1, b1, w2, b2 = params
    B, in_size = x.shape
    hidden = w1.shape[1]
    n_pad = w2.shape[1]

    if precision == "bf16":
        x = x.astype(jnp.bfloat16)       # halves streamed input bytes (mem-bound)
        out_dtype = jnp.bfloat16         # halves the store bytes too
    else:
        out_dtype = jnp.float32

    # --- batch tiling: sublane-align, then pick TM / pad batch to a whole grid ---
    b8 = _round_up(B, _SUBLANE)
    TM = _choose_tm(b8, tm_max)
    B_pad = _round_up(b8, TM)
    if B_pad != B:
        x = jnp.pad(x, ((0, B_pad - B), (0, 0)))

    grid = (B_pad // TM,)

    out = pl.pallas_call(
        _ffn_kernel,
        out_shape=jax.ShapeDtypeStruct((B_pad, n_pad), out_dtype),
        grid=grid,
        in_specs=[
            pl.BlockSpec((TM, in_size), lambda i: (i, 0)),       # x: tiled over batch
            pl.BlockSpec((in_size, hidden), lambda i: (0, 0)),   # w1: VMEM-resident
            pl.BlockSpec((1, hidden), lambda i: (0, 0)),         # b1: VMEM-resident
            pl.BlockSpec((hidden, n_pad), lambda i: (0, 0)),     # w2 (padded): resident
            pl.BlockSpec((1, n_pad), lambda i: (0, 0)),          # b2 (padded): resident
        ],
        out_specs=pl.BlockSpec((TM, n_pad), lambda i: (i, 0)),   # lane-dense output tile
        compiler_params=pltpu.CompilerParams(
            dimension_semantics=("parallel",),   # megacore sharding on v7x
            vmem_limit_bytes=32 * 1024 * 1024,   # big tiles land on v5e (16 MiB default)
        ),
    )(x, w1, b1, w2, b2)

    if slice_output:
        out = out[:B, :num_classes]
    return out


def _ref_forward(x, w1, b1, w2, b2):
    h = jnp.maximum(x @ w1 + b1, 0.0)
    return h @ w2 + b2


if __name__ == "__main__":
    key = jax.random.PRNGKey(0)
    input_size = 64
    hidden = 128           # fixed by the module definition
    num_classes = 16

    k_x, k_w1, k_b1, k_w2, k_b2, k_x2 = jax.random.split(key, 6)
    # Deterministic parameter init (uniform, similar in spirit to nn.Linear default).
    lim1 = 1.0 / (input_size ** 0.5)
    w1 = jax.random.uniform(k_w1, (input_size, hidden), jnp.float32, -lim1, lim1)
    b1 = jax.random.uniform(k_b1, (1, hidden), jnp.float32, -lim1, lim1)
    lim2 = 1.0 / (hidden ** 0.5)
    w2 = jax.random.uniform(k_w2, (hidden, num_classes), jnp.float32, -lim2, lim2)
    b2 = jax.random.uniform(k_b2, (1, num_classes), jnp.float32, -lim2, lim2)

    # ---- f32 path (exact-semantics), small batch -> single-step grid ----
    params_f32, n_cls = prepare_params(w1, b1, w2, b2, precision="f32")

    batch = 8
    x = jax.random.normal(k_x, (batch, input_size), dtype=jnp.float32)
    out = simple_feed_forward(x, params_f32, num_classes=n_cls)
    out = jax.block_until_ready(out)
    ref = _ref_forward(x, w1, b1, w2, b2)
    assert out.shape == (batch, num_classes)
    assert jnp.allclose(out, ref, atol=1e-5, rtol=1e-5)

    # ---- f32 path, mid-size batch -> exercises the 2-step tiled/padded grid ----
    batch2 = 300
    x2 = jax.random.normal(k_x2, (batch2, input_size), dtype=jnp.float32)
    out2 = simple_feed_forward(x2, params_f32, num_classes=n_cls)
    out2 = jax.block_until_ready(out2)
    ref2 = _ref_forward(x2, w1, b1, w2, b2)
    assert out2.shape == (batch2, num_classes)
    assert jnp.allclose(out2, ref2, atol=1e-5, rtol=1e-5)

    # ---- opt-in bf16 fast path (halves HBM traffic on v6e/v7x); loose tolerance ----
    params_bf16, _ = prepare_params(w1, b1, w2, b2, precision="bf16")
    out_bf16 = simple_feed_forward(x2, params_bf16, num_classes=n_cls,
                                   precision="bf16")
    out_bf16 = jax.block_until_ready(out_bf16)
    assert out_bf16.shape == (batch2, num_classes)
    assert jnp.allclose(out_bf16.astype(jnp.float32), ref2, atol=0.15, rtol=0.15)

    print("KERNEL_OK")
</pallas_src>

<mosaic_0001>
module attributes {stable_mosaic.version = 11 : i64} {
  func.func @_ffn_kernel(%arg0: i32, %arg1: memref<8x64xf32, #tpu.memory_space<vmem>>, %arg2: memref<64x128xf32, #tpu.memory_space<vmem>>, %arg3: memref<1x128xf32, #tpu.memory_space<vmem>>, %arg4: memref<128x128xf32, #tpu.memory_space<vmem>>, %arg5: memref<1x128xf32, #tpu.memory_space<vmem>>, %arg6: memref<8x128xf32, #tpu.memory_space<vmem>>) attributes {dimension_semantics = [#tpu.dimension_semantics<parallel>], iteration_bounds = array<i64: 1>, scalar_prefetch = 0 : i64, scratch_operands = 0 : i64, tpu.core_type = #tpu.core_type<tc>, window_params = [{transform_indices = @transform_0, window_bounds = array<i64: 8, 64>}, {pipeline_mode = #tpu.pipeline_mode<synchronous>, transform_indices = @transform_1, window_bounds = array<i64: 64, 128>}, {pipeline_mode = #tpu.pipeline_mode<synchronous>, transform_indices = @transform_2, window_bounds = array<i64: 1, 128>}, {pipeline_mode = #tpu.pipeline_mode<synchronous>, transform_indices = @transform_3, window_bounds = array<i64: 128, 128>}, {pipeline_mode = #tpu.pipeline_mode<synchronous>, transform_indices = @transform_4, window_bounds = array<i64: 1, 128>}, {transform_indices = @transform_5, window_bounds = array<i64: 8, 128>}]} {
    %c0 = arith.constant 0 : index
    %c0_0 = arith.constant 0 : index
    %0 = vector.load %arg1[%c0, %c0_0] : memref<8x64xf32, #tpu.memory_space<vmem>>, vector<8x64xf32>
    %c0_1 = arith.constant 0 : index
    %c0_2 = arith.constant 0 : index
    %1 = vector.load %arg2[%c0_1, %c0_2] : memref<64x128xf32, #tpu.memory_space<vmem>>, vector<64x128xf32>
    %cst = arith.constant dense<0.000000e+00> : vector<8x128xf32>
    %2 = tpu.matmul %0, %1, %cst {dimension_numbers = #tpu.dot_dimension_numbers<[1], [0], [0], [1], [0, 0, 1, 1], [], []>} : vector<8x64xf32>, vector<64x128xf32>, vector<8x128xf32> -> vector<8x128xf32>
    %c0_3 = arith.constant 0 : index
    %c0_4 = arith.constant 0 : index
    %3 = vector.load %arg3[%c0_3, %c0_4] : memref<1x128xf32, #tpu.memory_space<vmem>>, vector<1x128xf32>
    %4 = vector.broadcast %3 : vector<1x128xf32> to vector<8x128xf32>
    %5 = arith.addf %2, %4 : vector<8x128xf32>
    %cst_5 = arith.constant 0.000000e+00 : f32
    %6 = vector.broadcast %cst_5 : f32 to vector<8x128xf32>
    %7 = arith.maximumf %5, %6 : vector<8x128xf32>
    %c0_6 = arith.constant 0 : index
    %c0_7 = arith.constant 0 : index
    %8 = vector.load %arg4[%c0_6, %c0_7] : memref<128x128xf32, #tpu.memory_space<vmem>>, vector<128x128xf32>
    %cst_8 = arith.constant dense<0.000000e+00> : vector<8x128xf32>
    %9 = tpu.matmul %7, %8, %cst_8 {dimension_numbers = #tpu.dot_dimension_numbers<[1], [0], [0], [1], [0, 0, 1, 1], [], []>} : vector<8x128xf32>, vector<128x128xf32>, vector<8x128xf32> -> vector<8x128xf32>
    %c0_9 = arith.constant 0 : index
    %c0_10 = arith.constant 0 : index
    %10 = vector.load %arg5[%c0_9, %c0_10] : memref<1x128xf32, #tpu.memory_space<vmem>>, vector<1x128xf32>
    %11 = vector.broadcast %10 : vector<1x128xf32> to vector<8x128xf32>
    %12 = arith.addf %9, %11 : vector<8x128xf32>
    %c0_11 = arith.constant 0 : index
    %c0_12 = arith.constant 0 : index
    %13 = vector.load %arg6[%c0_11, %c0_12] : memref<8x128xf32, #tpu.memory_space<vmem>>, vector<8x128xf32>
    tpu.vector_store %arg6[%c0_11, %c0_12], %12 {strides = array<i32>} : memref<8x128xf32, #tpu.memory_space<vmem>>, vector<8x128xf32>,
    return
  }
  func.func @transform_0(%arg0: i32) -> (i32, i32) {
    %c0_i32 = arith.constant 0 : i32
    %c0_i32_0 = arith.constant 0 : i32
    return %arg0, %c0_i32 : i32, i32
  }
  func.func @transform_1(%arg0: i32) -> (i32, i32) {
    %c0_i32 = arith.constant 0 : i32
    %c0_i32_0 = arith.constant 0 : i32
    %c0_i32_1 = arith.constant 0 : i32
    return %c0_i32, %c0_i32_0 : i32, i32
  }
  func.func @transform_2(%arg0: i32) -> (i32, i32) {
    %c0_i32 = arith.constant 0 : i32
    %c0_i32_0 = arith.constant 0 : i32
    %c0_i32_1 = arith.constant 0 : i32
    return %c0_i32, %c0_i32_0 : i32, i32
  }
  func.func @transform_3(%arg0: i32) -> (i32, i32) {
    %c0_i32 = arith.constant 0 : i32
    %c0_i32_0 = arith.constant 0 : i32
    %c0_i32_1 = arith.constant 0 : i32
    return %c0_i32, %c0_i32_0 : i32, i32
  }
  func.func @transform_4(%arg0: i32) -> (i32, i32) {
    %c0_i32 = arith.constant 0 : i32
    %c0_i32_0 = arith.constant 0 : i32
    %c0_i32_1 = arith.constant 0 : i32
    return %c0_i32, %c0_i32_0 : i32, i32
  }
  func.func @transform_5(%arg0: i32) -> (i32, i32) {
    %c0_i32 = arith.constant 0 : i32
    %c0_i32_0 = arith.constant 0 : i32
    return %arg0, %c0_i32 : i32, i32
  }
}

</mosaic_0001>

<bundles_post_ra>
// kernel: simple_feed_forward.1
= control target key start
LH: loop header
LB: loop body
LE: loop exit
PB: predicated region body
PF: predicated region fallthrough
CT: control target
= control target key end

     0   :  { %10 = vsyncpa [#allocation3], 0  ;;  %s582_s0 = inlined_call_operand.hbm [shape: f32[8,64], index: 0, kind: input, shape index: {}]   ;;  %s583_s1 = inlined_call_operand.hbm [shape: f32[64,128], index: 1, kind: input, shape index: {}]   ;;  %s584_s2 = inlined_call_operand.vmem [shape: f32[1,128], index: 2, kind: input, shape index: {}]   ;;  %s585_s3 = inlined_call_operand.hbm [shape: f32[128,128], index: 3, kind: input, shape index: {}]   ;;  %s586_s4 = inlined_call_operand.vmem [shape: f32[1,128], index: 4, kind: input, shape index: {}]   ;;  %s587_s5 = inlined_call_operand.hbm [shape: f32[8,128], index: 5, kind: output, shape index: {}]  }
   0x1   :  { %11 = vsyncpa [#allocation6], 0 }
   0x2   :  { %12 = vsyncpa [#allocation4], 0  ;;  %s483_s18 = smov [#allocation5]   ;;  %s389_s22 = scalar_lea.hbm %s583_s1, 1024 }
   0x3   :  { %s28_s19 = sshll.u32 %s483_s18, 4  ;;  %p390_p0 = scmp.ne.s32.totalorder %s583_s1, %s389_s22  ;;  %s29_s19 = int_to_ptr.vmem [resolvable:$true] %s28_s19 }
   0x4   :  { %p393_p1 = scmp.lt.u32.totalorder %s389_s22, %s583_s1 }
   0x6   :  { %p395_p2 = pnand %p393_p1, %p390_p0 }
   0x8   :  { %398 = shalt.err (!%p395_p2)
}
   0x9   :  { %s399_s27 = scalar_lea.vmem %s29_s19, 1024  ;;  %p404_p4 = scmp.lt.s32.totalorder %s29_s19, %s29_s19 }
   0xa   :  { %p400_p3 = scmp.ne.s32.totalorder %s29_s19, %s399_s27  ;;  %p405_p5 = scmp.lt.s32.totalorder %s399_s27, %s399_s27 }
   0xc   :  { %p406_p6 = por %p405_p5, %p404_p4 }
   0xe   :  { %p407_p7 = pnand %p406_p6, %p400_p3 }
  0x10   :  { %410 = shalt.err (!%p407_p7)
}
  0x11   :  { %s484_s28 = smov 128   ;;  %s485_s29 = smov 8  }
  0x12   :  { %34 = dma.hbm_to_vmem [thread:$0]  %s583_s1, 1024, %s29_s19, [#allocation6], %s484_s28, %s484_s28, %s485_s29  }
  0x13   :  { %s486_s7 = smov [#allocation2]   ;;  %s487_s9 = smov [#allocation7]  }
  0x14   :  { %s19_s8 = sshll.u32 %s486_s7, 4  ;;  %s42_s10 = sshll.u32 %s487_s9, 4  ;;  %s20_s8 = int_to_ptr.vmem [resolvable:$true] %s19_s8  ;;  %s43_s10 = int_to_ptr.vmem [resolvable:$true] %s42_s10 }
  0x15   :  { %s411_s13 = scalar_lea.hbm %s582_s0, 128 }
  0x16   :  { %p412_p8 = scmp.ne.s32.totalorder %s582_s0, %s411_s13  ;;  %p415_p9 = scmp.lt.u32.totalorder %s411_s13, %s582_s0 }
  0x18   :  { %p417_p10 = pnand %p415_p9, %p412_p8 }
  0x1a   :  { %420 = shalt.err (!%p417_p10)
}
  0x1b   :  { %s421_s1 = scalar_lea.vmem %s20_s8, 128  ;;  %p426_p12 = scmp.lt.s32.totalorder %s20_s8, %s20_s8 }
  0x1c   :  { %p422_p11 = scmp.ne.s32.totalorder %s20_s8, %s421_s1  ;;  %p427_p13 = scmp.lt.s32.totalorder %s421_s1, %s421_s1 }
  0x1e   :  { %p428_p0 = por %p427_p13, %p426_p12 }
  0x20   :  { %p429_p1 = pnand %p428_p0, %p422_p11 }
  0x22   :  { %432 = shalt.err (!%p429_p1)
}
  0x23   :  { %22 = dma.hbm_to_vmem [thread:$0]  %s582_s0, 128, %s20_s8, [#allocation3]  }
  0x24   :  { %s433_s22 = scalar_lea.hbm %s585_s3, 2048 }
  0x25   :  { %p434_p2 = scmp.ne.s32.totalorder %s585_s3, %s433_s22  ;;  %p437_p3 = scmp.lt.u32.totalorder %s433_s22, %s585_s3 }
  0x27   :  { %p439_p4 = pnand %p437_p3, %p434_p2 }
  0x29   :  { %442 = shalt.err (!%p439_p4)
}
  0x2a   :  { %s443_s27 = scalar_lea.vmem %s43_s10, 2048  ;;  %p448_p6 = scmp.lt.s32.totalorder %s43_s10, %s43_s10 }
  0x2b   :  { %p444_p5 = scmp.ne.s32.totalorder %s43_s10, %s443_s27  ;;  %p449_p7 = scmp.lt.s32.totalorder %s443_s27, %s443_s27 }
  0x2d   :  { %p450_p8 = por %p449_p7, %p448_p6 }
  0x2f   :  { %p451_p9 = pnand %p450_p8, %p444_p5 }
  0x31   :  { %454 = shalt.err (!%p451_p9)
}
  0x32   :  { %48 = dma.hbm_to_vmem [thread:$0]  %s585_s3, 2048, %s43_s10, [#allocation6], %s484_s28, %s484_s28, %s485_s29  }
  0x33   :  { %477 = dma.done.wait [#allocation3], 128  }
  0x34   :  { %478 = vsyncadd [#allocation3], 4294967168 }
  0x35   :  { %479 = dma.done.wait [#allocation6], 3072  }
  0x36   :  { %480 = vsyncadd [#allocation6], 4294964224  ;;  %v488_v0 = vmov 0.0|0.0   ;;  %vm489_vm0 = vmmov 0   ;;  %v490_v1 = vmov 0.0   ;;  %v61_v2 = vld [vmem:[#allocation5] sm:$0xff] }
  0x37   :  { %344 = vmatprep.subr.bf16.mxu0 %v488_v0  ;;  %306 = vmatprep.mubr.msk.f32.mxu0 %vm489_vm0, %v490_v1  ;;  %v62_v3 = vld [vmem:[#allocation5 + $0x8] sm:$0xff]  ;;  %v63_v4 = vld [vmem:[#allocation5 + $0x10] sm:$0xff]  ;;  %v64_v6 = vld [vmem:[#allocation5 + $0x18] sm:$0xff]  ;;  %vm76_vm1 = vcmask 523264   ;;  %s491_s7 = smov [#allocation8]  }
  0x38   :  { %356 = vmatprep.subr.bf16.mxu1 %v488_v0  ;;  %341 = vmatprep.mubr.msk.f32.mxu1 %vm489_vm0, %v490_v1  ;;  %v345_v5 = vpack.c.bf16 %v62_v3, %v61_v2  ;;  %v348_v7 = vpack.c.bf16 %v64_v6, %v63_v4  ;;  %v151_v8 = vld [vmem:[#allocation7] sm:$0xff]  ;;  %v152_v9 = vld [vmem:[#allocation7 + $0x8] sm:$0xff]  ;;  %v153_v10 = vld [vmem:[#allocation7 + $0x10] sm:$0xff]  ;;  %s251_s8 = sshll.u32 %s491_s7, 4  ;;  %s252_s8 = int_to_ptr.vmem [resolvable:$true] %s251_s8 }
  0x39   :  { %v65_v11 = vld [vmem:[#allocation5 + $0x20] sm:$0xff]  ;;  %v66_v12 = vld [vmem:[#allocation5 + $0x28] sm:$0xff]  ;;  %v357_v13 = vpack.c.bf16 %v152_v9, %v151_v8  ;;  %v154_v14 = vld [vmem:[#allocation7 + $0x18] sm:$0xff]  ;;  %s455_s9 = scalar_lea.vmem %s252_s8, 128  ;;  %p460_p11 = scmp.lt.s32.totalorder %s252_s8, %s252_s8 }
  0x3a   :  { %346 = vmatpush3.bf16.msra.mxu0 %v345_v5  ;;  %v360_v15 = vpack.c.bf16 %v154_v14, %v153_v10  ;;  %v351_v16 = vpack.c.bf16 %v66_v12, %v65_v11  ;;  %v155_v17 = vld [vmem:[#allocation7 + $0x20] sm:$0xff]  ;;  %v156_v18 = vld [vmem:[#allocation7 + $0x28] sm:$0xff]  ;;  %v67_v19 = vld [vmem:[#allocation5 + $0x30] sm:$0xff]  ;;  %p456_p10 = scmp.ne.s32.totalorder %s252_s8, %s455_s9  ;;  %p461_p12 = scmp.lt.s32.totalorder %s455_s9, %s455_s9 }
  0x3b   :  { %347 = vmatprep.subr.bf16.mxu0 %v488_v0  ;;  %358 = vmatpush3.bf16.msra.mxu1 %v357_v13  ;;  %v68_v20 = vld [vmem:[#allocation5 + $0x38] sm:$0xff]  ;;  %v363_v21 = vpack.c.bf16 %v156_v18, %v155_v17  ;;  %v157_v23 = vld [vmem:[#allocation7 + $0x30] sm:$0xff]  ;;  %v159_v27 = vld [vmem:[#allocation7 + $0x40] sm:$0xff] }
  0x3c   :  { %359 = vmatprep.subr.bf16.mxu1 %v488_v0  ;;  %v354_v22 = vpack.c.bf16 %v68_v20, %v67_v19  ;;  %v158_v24 = vld [vmem:[#allocation7 + $0x38] sm:$0xff]  ;;  %v160_v28 = vld [vmem:[#allocation7 + $0x48] sm:$0xff]  ;;  %v161_v30 = vld [vmem:[#allocation7 + $0x50] sm:$0xff]  ;;  %p462_p13 = por %p461_p12, %p460_p11 }
  0x3d   :  { %v366_v25 = vpack.c.bf16 %v158_v24, %v157_v23  ;;  %v60_v26 = vld [vmem:[#allocation2] sm:$0xff]  ;;  %v369_v29 = vpack.c.bf16 %v160_v28, %v159_v27  ;;  %v163_v33 = vld [vmem:[#allocation7 + $0x60] sm:$0xff]  ;;  %v164_v34 = vld [vmem:[#allocation7 + $0x68] sm:$0xff] }
  0x3e   :  { %349 = vmatpush3.bf16.msra.mxu0 %v348_v7  ;;  %v162_v31 = vld [vmem:[#allocation7 + $0x58] sm:$0xff]  ;;  %v375_v35 = vpack.c.bf16 %v164_v34, %v163_v33  ;;  %v165_v36 = vld [vmem:[#allocation7 + $0x70] sm:$0xff]  ;;  %p463_p0 = pnand %p462_p13, %p456_p10 }
  0x3f   :  { %350 = vmatprep.subr.bf16.mxu0 %v488_v0  ;;  %361 = vmatpush3.bf16.msra.mxu1 %v360_v15  ;;  %v372_v32 = vpack.c.bf16 %v162_v31, %v161_v30  ;;  %v166_v37 = vld [vmem:[#allocation7 + $0x78] sm:$0xff] }
  0x40   :  { %362 = vmatprep.subr.bf16.mxu1 %v488_v0  ;;  %v378_v38 = vpack.c.bf16 %v166_v37, %v165_v36  ;;  %v261_v39 = vld [vmem:[%s584_s2] ss:$0 sm:$0xff] }
  0x41   :  { %v263_v44 = vld [vmem:[%s586_s4] ss:$0 sm:$0xff] }
  0x42   :  { %352 = vmatpush3.bf16.msra.mxu0 %v351_v16 }
  0x43   :  { %353 = vmatprep.subr.bf16.mxu0 %v488_v0  ;;  %364 = vmatpush3.bf16.msra.mxu1 %v363_v21 }
  0x44   :  { %365 = vmatprep.subr.bf16.mxu1 %v488_v0 }
  0x46   :  { %355 = vmatpush3.bf16.msra.mxu0 %v354_v22 }
  0x47   :  { %367 = vmatpush3.bf16.msra.mxu1 %v366_v25 }
  0x48   :  { %368 = vmatprep.subr.bf16.mxu1 %v488_v0 }
  0x49   :  { %307 = vmatmul.mubr.msk.f32.vlgmr.msra.gmra.mrb[0].mxu0 %vm76_vm1, %v60_v26 }
  0x4b   :  { %370 = vmatpush3.bf16.msra.mxu1 %v369_v29 }
  0x4c   :  { %371 = vmatprep.subr.bf16.mxu1 %v488_v0 }
  0x4f   :  { %373 = vmatpush3.bf16.msra.mxu1 %v372_v32 }
  0x50   :  { %374 = vmatprep.subr.bf16.mxu1 %v488_v0 }
  0x53   :  { %376 = vmatpush3.bf16.msra.mxu1 %v375_v35 }
  0x54   :  { %377 = vmatprep.subr.bf16.mxu1 %v488_v0 }
  0x57   :  { %379 = vmatpush3.bf16.msra.mxu1 %v378_v38 }
 0x11c   :  { %v146_v40 = vpop.f32.mrb[0].mxu0 }
 0x11d   :  { %v147_v41 = vadd.f32 %v261_v39, %v146_v40  ;;  %v308_v42 = vpop.f32.mrb[1].mxu0 }
 0x11f   :  { %v150_v43 = vmax.f32 %v147_v41, 0.0 }
 0x121   :  { %342 = vmatmul.mubr.f32.vlgmr.msra.gmra.mrb[0].mxu1 %v150_v43 }
 0x1f4   :  { %v240_v45 = vpop.f32.mrb[0].mxu1 }
 0x1f5   :  { %v241_v46 = vadd.f32 %v263_v44, %v240_v45  ;;  %v343_v47 = vpop.f32.mrb[1].mxu1 }
 0x1f7   :  { %244 = vst [vmem:[#allocation8] sm:$0xff] %v241_v46 }
 0x1f8   :  { %466 = shalt.err (!%p463_p0)
}
 0x1f9   :  { %s467_s11 = scalar_lea.hbm %s587_s5, 128 }
 0x1fa   :  { %p468_p1 = scmp.ne.s32.totalorder %s587_s5, %s467_s11  ;;  %p471_p2 = scmp.lt.u32.totalorder %s467_s11, %s587_s5 }
 0x1fc   :  { %p473_p3 = pnand %p471_p2, %p468_p1 }
 0x1fe   :  { %476 = shalt.err (!%p473_p3)
}
 0x1ff   :  { %254 = dma.vmem_to_hbm [thread:$0]  %s252_s8, 128, %s587_s5, [#allocation4]  }
 0x200   :  { %481 = dma.done.wait [#allocation4], 128  }
 0x201   :  { %482 = vsyncadd [#allocation4], 4294967168 }
 0x202   :  { %258 = vsyncpa [#allocation3], 1 }
 0x203   :  { %259 = vsyncpa [#allocation6], 1 }
 0x204   :  { %260 = vsyncpa [#allocation4], 1 }

</bundles_post_ra>
